<compile_context>
chip_gen: v7x
topology: tpu7x:2x2x1
jax: 0.10.0
libtpu: 0.0.40
codegen_flags: <defaults>
</compile_context>

<pallas_src>
import math

import jax
import jax.numpy as jnp
from jax.experimental import pallas as pl
from jax.experimental.pallas import tpu as pltpu

_LANE = 128


def flatten(x: jax.Array) -> jax.Array:
    """Production Flatten: torch `x.view(-1, prod(x.shape[1:]))`.

    On a contiguous array this is a metadata-only reshape (zero HBM traffic)
    and exactly matches torch's .view element ordering.
    """
    n = x.shape[0]
    f = int(math.prod(x.shape[1:]))
    return x.reshape(n, f)


def _copy_kernel(x_ref, o_ref):
    # Identity copy of one (tile_r, tile_l) VMEM block.
    o_ref[...] = x_ref[...]


def _round_down(v: int, m: int) -> int:
    return (v // m) * m


def _round_up(v: int, m: int) -> int:
    return ((v + m - 1) // m) * m


def _default_block_bytes() -> int:
    """Per-generation block-byte budget.

    in+out are each double-buffered, so ~4x block bytes are in flight:
      * v6e / v7x: 32 MiB scoped-VMEM default -> 4 MiB blocks (~16 MiB in flight).
      * v5e (16 MiB default) / unknown: 3 MiB blocks (~12 MiB in flight).
    """
    try:
        kind = jax.devices()[0].device_kind.lower()
    except Exception:  # pragma: no cover - defensive, e.g. no devices yet
        kind = ""
    if "v6" in kind or "v7" in kind:
        return 4 * 1024 * 1024
    return 3 * 1024 * 1024


def _choose_copy_layout(n, f, itemsize, target_block_bytes):
    """Pick a lane-dense 2D view (R, L) of the flat n*f stream and its tile."""
    total = n * f
    # Packed sublane granularity: 8 rows for 32-bit, 16 for bf16, 32 for int8.
    gran = max(8, 32 // max(1, itemsize))
    budget = max(gran * _LANE, target_block_bytes // itemsize)  # elems / block

    # ---- 2D view of the contiguous element stream --------------------------
    if f >= _LANE and f % _LANE == 0:
        # Natural (n, f) view is already lane-aligned.
        R, L = n, f
    elif total % _LANE == 0:
        # Flatten is a pure contiguous identity copy, so the block
        # decomposition need not respect the logical (n, f) shape: re-tile the
        # flat stream with a wide lane axis (largest power-of-two multiple of
        # 128 dividing `total`, capped by the block budget) so stores are
        # unmasked; any ragged remainder lands on the sublane axis.
        max_l = max(_LANE, _round_down(budget // gran, _LANE))
        L = _LANE
        while total % (L * 2) == 0 and L * 2 <= max_l:
            L *= 2
        R = total // L
    else:
        # No exact lane-dense factorization exists; keep the logical (n, f)
        # view and accept masked stores on the ragged lane edge.
        R, L = n, f

    # ---- Joint tile sizing: lanes first, then sublanes ----------------------
    if L <= _LANE:
        tile_l = L  # full-dim block (always legal)
    else:
        tile_l = min(L, max(_LANE, _round_down(budget // min(R, gran), _LANE)))
    tile_r = min(R, max(gran, _round_down(budget // max(tile_l, 1), gran)))

    # ---- Guarantee >= 2 grid steps so both v7x TensorCores get work ---------
    if pl.cdiv(R, tile_r) * pl.cdiv(L, tile_l) == 1:
        if R >= 2 * gran:
            tile_r = _round_up(pl.cdiv(R, 2), gran)
        elif L >= 2 * _LANE:
            tile_l = _round_up(pl.cdiv(L, 2), _LANE)
        # else: tensor too small to split with aligned tiles; keep one step.

    return (R, L), (tile_r, tile_l)


def flatten_pallas(x: jax.Array, *, target_block_bytes: int | None = None) -> jax.Array:
    """Flatten via an explicit Pallas copy kernel (benchmark / demo path)."""
    n = x.shape[0]
    f = int(math.prod(x.shape[1:]))
    itemsize = jnp.dtype(x.dtype).itemsize
    if target_block_bytes is None:
        target_block_bytes = _default_block_bytes()

    (R, L), (tile_r, tile_l) = _choose_copy_layout(n, f, itemsize, target_block_bytes)

    # Both reshapes below are metadata-only on a contiguous input.
    x2d = x.reshape(R, L)
    grid = (pl.cdiv(R, tile_r), pl.cdiv(L, tile_l))

    out = pl.pallas_call(
        _copy_kernel,
        out_shape=jax.ShapeDtypeStruct((R, L), x.dtype),
        grid_spec=pltpu.PrefetchScalarGridSpec(
            num_scalar_prefetch=0,
            grid=grid,
            in_specs=[pl.BlockSpec((tile_r, tile_l), lambda i, j: (i, j))],
            out_specs=pl.BlockSpec((tile_r, tile_l), lambda i, j: (i, j)),
        ),
        compiler_params=pltpu.CompilerParams(
            # Pure copy: every grid step is independent -> both axes parallel
            # (lets v7x shard grid steps across its 2 TensorCores).
            dimension_semantics=("parallel", "parallel"),
            # Explicit headroom; 32 MiB is within every generation's physical
            # VMEM (v7x: 64 MiB/TC) and covers 4x the largest block budget.
            vmem_limit_bytes=32 * 1024 * 1024,
        ),
        # Memory-bound cost hint so XLA can overlap surrounding ops.
        cost_estimate=pl.CostEstimate(
            flops=0,
            transcendentals=0,
            bytes_accessed=2 * n * f * itemsize,
        ),
    )(x2d)

    return out.reshape(n, f)


if __name__ == "__main__":
    key = jax.random.PRNGKey(0)
    # Small NCHW input consistent with the module's usage.
    x = jax.random.normal(key, (2, 4, 16, 16), dtype=jnp.float32)

    expected = x.reshape(x.shape[0], -1)

    # Production (metadata-only) path.
    y_fast = flatten(x)
    jax.block_until_ready(y_fast)
    assert y_fast.shape == (2, 4 * 16 * 16)
    assert y_fast.dtype == x.dtype
    assert bool(jnp.array_equal(y_fast, expected))

    # Explicit Pallas copy-kernel path.
    y_kernel = flatten_pallas(x)
    jax.block_until_ready(y_kernel)
    assert y_kernel.shape == (2, 4 * 16 * 16)
    assert y_kernel.dtype == x.dtype
    assert bool(jnp.array_equal(y_kernel, expected))

    print("KERNEL_OK")
</pallas_src>

<mosaic_0001>
module attributes {stable_mosaic.version = 11 : i64} {
  func.func @_copy_kernel(%arg0: i32, %arg1: i32, %arg2: memref<2x512xf32, #tpu.memory_space<vmem>>, %arg3: memref<2x512xf32, #tpu.memory_space<vmem>>) attributes {dimension_semantics = [#tpu.dimension_semantics<parallel>, #tpu.dimension_semantics<parallel>], iteration_bounds = array<i64: 1, 2>, scalar_prefetch = 0 : i64, scratch_operands = 0 : i64, tpu.core_type = #tpu.core_type<tc>, window_params = [{transform_indices = @transform_0, window_bounds = array<i64: 2, 512>}, {transform_indices = @transform_1, window_bounds = array<i64: 2, 512>}]} {
    %c0 = arith.constant 0 : index
    %c0_0 = arith.constant 0 : index
    %0 = vector.load %arg2[%c0, %c0_0] : memref<2x512xf32, #tpu.memory_space<vmem>>, vector<2x512xf32>
    %c0_1 = arith.constant 0 : index
    %c0_2 = arith.constant 0 : index
    %1 = vector.load %arg3[%c0_1, %c0_2] : memref<2x512xf32, #tpu.memory_space<vmem>>, vector<2x512xf32>
    tpu.vector_store %arg3[%c0_1, %c0_2], %0 {strides = array<i32>} : memref<2x512xf32, #tpu.memory_space<vmem>>, vector<2x512xf32>,
    return
  }
  func.func @transform_0(%arg0: i32, %arg1: i32) -> (i32, i32) {
    %c0_i32 = arith.constant 0 : i32
    return %arg0, %arg1 : i32, i32
  }
  func.func @transform_1(%arg0: i32, %arg1: i32) -> (i32, i32) {
    %c0_i32 = arith.constant 0 : i32
    return %arg0, %arg1 : i32, i32
  }
}

</mosaic_0001>

<bundles_post_ra>
// kernel: tpu_custom_call.1
= control target key start
LH: loop header
LB: loop body
LE: loop exit
PB: predicated region body
PF: predicated region fallthrough
CT: control target
= control target key end

     0   :  { %6 = vsyncpa [#allocation3], 0  ;;  %s633_s0 = inlined_call_operand.hbm [shape: f32[2,1024], index: 0, kind: input, shape index: {}]   ;;  %s634_s1 = inlined_call_operand.hbm [shape: f32[2,1024], index: 1, kind: output, shape index: {}]  }
   0x1   :  { %8 = vsyncpa [#allocation3 + $0x1], 0 }
   0x2   :  { %9 = vsyncpa [#allocation4], 0 }
   0x3   :  { %11 = vsyncpa [#allocation4 + $0x1], 0  ;;  %s461_s6 = smov 0   ;;  %s463_s7 = smov 0  }
   0x4   :  { %s465_s8 = smov 0   ;;  %s467_s9 = smov 0  }
   0x5   :  { %s469_s10 = smov 0   ;;  %s471_s11 = smov 0  }
   0x6 LB: > { %s256_s12 = sadd.s32 4294967295, %s447_s11   ;;  %s257_s13 = sadd.s32 4294967294, %s447_s11   ;;  %s447_s11 = sphi %s471_s11, %s17_s11   ;;  %s443_s10 = sphi %s469_s10, %s650_s10   ;;  %s439_s9 = sphi %s467_s9, %s649_s9   ;;  %s435_s8 = sphi %s465_s8, %s648_s8   ;;  %s431_s7 = sphi %s463_s7, %s647_s7   ;;  %s427_s6 = sphi %s461_s6, %s646_s6  }
   0x7   : > { %s26_s14 = sadd.s32 1, %s443_s10  ;;  %s38_s15 = sadd.s32 1, %s435_s8 }
   0x8   : > { %p27_p0 = scmp.ge.s32.totalorder %s26_s14, 2  ;;  %p45_p1 = scmp.ne.s32.totalorder %s435_s8, %s431_s7 }
   0x9   : > { %p46_p2 = scmp.eq.s32.totalorder %s447_s11, 0  ;;  %p51_p3 = scmp.ne.s32.totalorder %s431_s7, %s427_s6 }
   0xa   : > { %s652_s14 = smov (%p27_p0, %s26_s14), 0  ;;  %p52_p5 = scmp.eq.s32.totalorder %s256_s12, 0 }
   0xb   : > { %p502_p4 = por %p46_p2, %p45_p1  ;;  %s34_s17 = ssub.s32 %s443_s10, %s652_s14 }
   0xc   : > { %p77_p6 = scmp.eq.s32.totalorder %s256_s12, 1  ;;  %p36_p7 = scmp.eq.s32.totalorder %s34_s17, 0 }
   0xd   : > { %p508_p8 = por %p52_p5, %p51_p3  ;;  %p83_p10 = scmp.eq.s32.totalorder %s257_s13, 1 }
   0xe   : > { %p512_p9 = por %p77_p6, %p45_p1  ;;  %p285_p13 = scmp.lt.s32.totalorder %s447_s11, 2 }
   0xf   : > { %s517_s20 = scalar_select %p36_p7, %s435_s8, %s38_s15  }
  0x10   : > { %s638_s19 = scalar_select %p512_p9, 1, 0 }
  0x11   : > { %p519_p11 = por %p83_p10, %p51_p3  ;;  %s103_s22 = sand.u32 1, %s435_s8  }
  0x12   : > { %s260_s23 = sshll.u32 %s103_s22, 3  ;;  %s271_s24 = sshll.u32 %s443_s10, 7 }
  0x13   : > { %s639_s21 = scalar_select %p519_p11, 1, 0 }
  0x14   : > { %s530_s27 = scalar_lea.hbm %s633_s0, %s271_s24  ;;  %s107_s28 = scalar_lea.vmem [#allocation2], %s260_s23 }
  0x15   : > { %s117_s29 = sshll.u32 %s107_s28, 4  ;;  %p536_p0 = pnand %p285_p13, %p502_p4  ;;  %s532_s29 = int_to_ptr.vmem [resolvable:$true] %s117_s29 }
  0x16   : > { %s104_s2 = scalar_lea.sflag [#allocation3], %s103_s22  ;;  %s335_s3 = scalar_lea.hbm %s530_s27, 128 }
  0x17   : > { %p336_p3 = scmp.ne.s32.totalorder %s530_s27, %s335_s3  ;;  %p337_p5 = pneg %p536_p0 }
  0x18   : > { %s340_s12 = scalar_lea.hbm %s633_s0, 256  ;;  %p341_p4 = scmp.lt.u32.totalorder %s530_s27, %s633_s0 }
  0x19   : > { %p338_p6 = pnand %p337_p5, %p336_p3  ;;  %p342_p10 = scmp.lt.u32.totalorder %s340_s12, %s335_s3 }
  0x1a   : > { %p344_p12 = scmp.lt.u32.totalorder %s335_s3, %s530_s27 }
  0x1b   : > { %p339_p7 = pneg %p338_p6  ;;  %p343_p13 = por %p342_p10, %p341_p4 }
  0x1d   : > { %p345_p1 = por %p344_p12, %p343_p13 }
  0x1f   : > { %p346_p2 = pnand %p345_p1, %p339_p7 }
  0x21   : > { %349 = shalt.err (!%p346_p2)
}
  0x22   : > { %s350_s16 = scalar_lea.vmem %s532_s29, 128  ;;  %s449_s17 = smov [#allocation2]  }
  0x23   : > { %p351_p3 = scmp.ne.s32.totalorder %s532_s29, %s350_s16  ;;  %s355_s22 = sshll.u32 %s449_s17, 4  ;;  %s356_s22 = int_to_ptr.vmem [resolvable:$false] %s355_s22 }
  0x24   : > { %s357_s23 = scalar_lea.vmem %s356_s22, 256  ;;  %p358_p9 = scmp.lt.s32.totalorder %s532_s29, %s356_s22 }
  0x25   : > { %p353_p6 = pnand %p351_p3, %p337_p5  ;;  %p359_p4 = scmp.lt.s32.totalorder %s357_s23, %s350_s16 }
  0x27   : > { %p354_p11 = pneg %p353_p6  ;;  %p360_p10 = por %p359_p4, %p358_p9 }
  0x29   : > { %p361_p12 = pnand %p360_p10, %p354_p11 }
  0x2b   : > { %364 = shalt.err (!%p361_p12)
}
  0x2c   : > { %280 = dma.hbm_to_vmem [thread:$0]  (!%p536_p0), %s530_s27, 128, %s532_s29, %s104_s2  }
  0x2d   : > { %p641_p1 = scmp.lt.s32.totalorder %s447_s11, 3  ;;  %p642_p2 = scmp.ge.s32.totalorder %s447_s11, 1 }
  0x2f   : > { %p123_p5 = pnand %p642_p2, %p641_p1 }
  0x30   : > { %s572_s24 = sand.u32 (!%p123_p5), 1, %s431_s7  }
  0x31   : > { %126 = sbr.rel (%p123_p5) target bundleno = 83 (0x53), region = 24  ;;  %s264_s25 = sshll.u32 (!%p123_p5), %s572_s24, 3 }
  0x32   : > { %s129_s26 = scalar_lea.sflag (!%p123_p5), [#allocation3], %s572_s24  ;;  %s132_s28 = scalar_lea.vmem (!%p123_p5), [#allocation2], %s264_s25 }
  0x38   : > { %418 = dma.done.wait (%p508_p8), %s129_s26, 128  }
  0x39   : > { %420 = vsyncadd (%p508_p8), %s129_s26, 4294967168  ;;  %s150_s27 = scalar_lea.vmem [#allocation5], %s264_s25  ;;  %s272_s30 = sshll.u32 %s439_s9, 7  ;;  %v153_v0 = vld [vmem:[%s132_s28] sm:$0xff] }
  0x3a   : > { %s172_s29 = sshll.u32 %s150_s27, 4  ;;  %s586_s4 = scalar_lea.hbm %s634_s1, %s272_s30  ;;  %154 = vst [vmem:[%s150_s27] sm:$0xff] %v153_v0  ;;  %s581_s29 = int_to_ptr.vmem [resolvable:$true] %s172_s29 }
  0x3b   : > { %s156_s18 = scalar_lea.sflag [#allocation4], %s572_s24  ;;  %s365_s5 = scalar_lea.vmem %s581_s29, 128 }
  0x3c   : > { %p366_p8 = scmp.ne.s32.totalorder %s581_s29, %s365_s5  ;;  %p643_p9 = scmp.ne.s32.totalorder %s638_s19, 0 }
  0x3d   : > { %s450_s12 = smov [#allocation5]  }
  0x3e   : > { %p367_p11 = pnand %p366_p8, %p643_p9  ;;  %s369_s9 = sshll.u32 %s450_s12, 4  ;;  %s370_s9 = int_to_ptr.vmem [resolvable:$false] %s369_s9 }
  0x3f   : > { %s371_s13 = scalar_lea.vmem %s370_s9, 256  ;;  %p372_p7 = scmp.lt.s32.totalorder %s581_s29, %s370_s9 }
  0x40   : > { %p368_p0 = pneg %p367_p11  ;;  %p373_p13 = scmp.lt.s32.totalorder %s371_s13, %s365_s5 }
  0x42   : > { %p374_p3 = por %p373_p13, %p372_p7 }
  0x44   : > { %p375_p6 = pnand %p374_p3, %p368_p0 }
  0x46   : > { %378 = shalt.err (!%p375_p6)
}
  0x47   : > { %s379_s15 = scalar_lea.hbm %s586_s4, 128  ;;  %s383_s22 = scalar_lea.hbm %s634_s1, 256 }
  0x48   : > { %p380_p4 = scmp.ne.s32.totalorder %s586_s4, %s379_s15  ;;  %p384_p1 = scmp.lt.u32.totalorder %s586_s4, %s634_s1 }
  0x49   : > { %p385_p2 = scmp.lt.u32.totalorder %s383_s22, %s379_s15  ;;  %p387_p8 = scmp.lt.u32.totalorder %s379_s15, %s586_s4 }
  0x4a   : > { %p381_p10 = pnand %p380_p4, %p643_p9 }
  0x4b   : > { %p386_p5 = por %p385_p2, %p384_p1 }
  0x4c   : > { %p382_p12 = pneg %p381_p10 }
  0x4d   : > { %p388_p11 = por %p387_p8, %p386_p5 }
  0x4f   : > { %p389_p0 = pnand %p388_p11, %p382_p12 }
  0x51   : > { %392 = shalt.err (!%p389_p0)
}
  0x52   : > { %275 = dma.vmem_to_hbm [thread:$0]  (%p643_p9), %s581_s29, 128, %s586_s4, %s156_s18  }
  0x53 PF: > { %s184_s25 = sand.u32 1, %s427_s6   ;;  %p644_p7 = scmp.ne.s32.totalorder %s639_s21, 0 }
  0x54   : > { %p645_p13 = scmp.ge.s32.totalorder %s447_s11, 2  ;;  %s185_s26 = scalar_lea.sflag [#allocation4], %s184_s25 }
  0x56   : > { %p282_p3 = pnand %p645_p13, %p644_p7 }
  0x58   : > { %422 = dma.done.wait (!%p282_p3), %s185_s26, 128  }
  0x59   : > { %424 = vsyncadd (!%p282_p3), %s185_s26, 4294967168  ;;  %s17_s11 = sadd.s32 1, %s447_s11   ;;  %s646_s6 = smov %s431_s7 }
  0x5a   : > { %p14_p6 = scmp.ge.s32.totalorder %s17_s11, 4   ;;  %s647_s7 = smov %s435_s8 }
  0x5b   : > { %s648_s8 = smov %s517_s20  ;;  %s649_s9 = smov %s443_s10 }
  0x5c   : > { %s650_s10 = smov %s652_s14  ;;  %16 = sbr.rel (!%p14_p6) target bundleno = 6 (0x6), region = 69 }
  0x63   :  { %190 = vsyncpa [#allocation3], 1 }
  0x64   :  { %192 = vsyncpa [#allocation3 + $0x1], 1 }
  0x65   :  { %193 = vsyncpa [#allocation4], 1 }
  0x66   :  { %195 = vsyncpa [#allocation4 + $0x1], 1 }

</bundles_post_ra>
